<compile_context>
chip_gen: v7x
topology: tpu7x:2x2x1
jax: 0.10.0
libtpu: 0.0.40
codegen_flags: <defaults>
</compile_context>

<pallas_src>
import functools

import jax
import jax.numpy as jnp
from jax import lax
from jax.experimental import pallas as pl
from jax.experimental.pallas import tpu as pltpu


# ----------------------------------------------------------------------------
# Generation-aware VMEM budget (v5e/v6e: 128 MiB physical, v7x: 64 MiB).
# ----------------------------------------------------------------------------
def _vmem_limit_bytes():
    cap = 64 * 1024 * 1024
    try:
        cap = int(pltpu.get_tpu_info().vmem_capacity_bytes)
    except Exception:
        pass
    if cap <= 0:
        cap = 64 * 1024 * 1024
    # Leave headroom for double-buffered inputs / compiler scratch.
    return max(32 * 1024 * 1024, min((cap * 3) // 4, 96 * 1024 * 1024))


def _round_up(x, m):
    return ((x + m - 1) // m) * m


# ----------------------------------------------------------------------------
# Single-block kernel (whole problem in VMEM, no grid) — tiny shapes only.
# ----------------------------------------------------------------------------
def _single_block_kernel(x_ref, w_ref, o_ref, *, d_out, compute_dtype,
                         approx_recip):
    x = x_ref[...].astype(compute_dtype)
    w = w_ref[...].astype(compute_dtype)

    # Fused projection: (T, d_in) @ (d_in, 3*d_out); scale already in W_q.
    qkv = jnp.dot(x, w, preferred_element_type=jnp.float32)
    q = qkv[:, :d_out].astype(compute_dtype)
    k = qkv[:, d_out:2 * d_out].astype(compute_dtype)
    v = qkv[:, 2 * d_out:3 * d_out].astype(compute_dtype)

    # q @ k.T without a materialized transpose.
    s = lax.dot_general(q, k, dimension_numbers=(((1,), (1,)), ((), ())),
                        preferred_element_type=jnp.float32)

    m = jnp.max(s, axis=-1, keepdims=True)
    e = jnp.exp(s - m)
    denom = jnp.sum(e, axis=-1, keepdims=True)
    p = e * pl.reciprocal(denom, approx=approx_recip)

    ctx = jnp.dot(p.astype(compute_dtype), v,
                  preferred_element_type=jnp.float32)
    o_ref[...] = ctx.astype(o_ref.dtype)


def _single_block(x, w_qkv, d_out, compute_dtype, vmem_limit):
    T = x.shape[0]
    kernel = functools.partial(
        _single_block_kernel, d_out=d_out, compute_dtype=compute_dtype,
        approx_recip=(compute_dtype != jnp.float32))
    return pl.pallas_call(
        kernel,
        out_shape=jax.ShapeDtypeStruct((T, d_out), x.dtype),
        in_specs=[pl.BlockSpec(memory_space=pltpu.MemorySpace.VMEM),
                  pl.BlockSpec(memory_space=pltpu.MemorySpace.VMEM)],
        out_specs=pl.BlockSpec(memory_space=pltpu.MemorySpace.VMEM),
        compiler_params=pltpu.CompilerParams(vmem_limit_bytes=vmem_limit),
    )(x, w_qkv)


# ----------------------------------------------------------------------------
# K/V projection: one lane-dense (T_pad, 2*d_out) slab output.
# ----------------------------------------------------------------------------
def _kv_proj_kernel(x_ref, w_ref, kv_ref, *, compute_dtype):
    x = x_ref[...].astype(compute_dtype)
    w = w_ref[...].astype(compute_dtype)
    kv_ref[...] = jnp.dot(
        x, w, preferred_element_type=jnp.float32).astype(kv_ref.dtype)


def _kv_projection(x_pad, w_kv, compute_dtype, tr, vmem_limit):
    t_pad, d_in = x_pad.shape
    two_d_out = w_kv.shape[1]
    kernel = functools.partial(_kv_proj_kernel, compute_dtype=compute_dtype)
    return pl.pallas_call(
        kernel,
        out_shape=jax.ShapeDtypeStruct((t_pad, two_d_out), compute_dtype),
        grid_spec=pltpu.PrefetchScalarGridSpec(
            num_scalar_prefetch=0,
            grid=(t_pad // tr,),
            in_specs=[pl.BlockSpec((tr, d_in), lambda i: (i, 0)),
                      pl.BlockSpec((d_in, two_d_out), lambda i: (0, 0))],
            out_specs=pl.BlockSpec((tr, two_d_out), lambda i: (i, 0)),
        ),
        compiler_params=pltpu.CompilerParams(
            dimension_semantics=("parallel",),
            vmem_limit_bytes=vmem_limit),
    )(x_pad, w_kv)


# ----------------------------------------------------------------------------
# Single-pass attention kernel: whole K/V slab resident, no online-softmax
# state.  Q projection fused (computed per q-tile from the x row-tile).
# ----------------------------------------------------------------------------
def _fused_single_pass_kernel(xq_ref, wq_ref, kv_ref, o_ref,
                              *, d_out, t_actual, t_pad, compute_dtype):
    q = jnp.dot(xq_ref[...].astype(compute_dtype),
                wq_ref[...].astype(compute_dtype),
                preferred_element_type=jnp.float32).astype(compute_dtype)
    kv = kv_ref[...]
    k = kv[:, :d_out]
    v = kv[:, d_out:]

    s = lax.dot_general(q, k, dimension_numbers=(((1,), (1,)), ((), ())),
                        preferred_element_type=jnp.float32)     # (tq, T_pad)
    if t_pad != t_actual:   # mask padded key columns (static no-op otherwise)
        col = lax.broadcasted_iota(jnp.int32, s.shape, 1)
        s = jnp.where(col < t_actual, s, -jnp.inf)

    m = jnp.max(s, axis=-1, keepdims=True)
    e = jnp.exp(s - m)
    denom = jnp.sum(e, axis=-1, keepdims=True)
    p = e * pl.reciprocal(denom, approx=True)

    ctx = jnp.dot(p.astype(compute_dtype), v,
                  preferred_element_type=jnp.float32)
    o_ref[...] = ctx.astype(o_ref.dtype)


# ----------------------------------------------------------------------------
# Online-softmax flash kernel (kv-tiled) with fused Q projection.
# ----------------------------------------------------------------------------
def _flash_kernel(xq_ref, wq_ref, kv_ref, o_ref, q_sc, m_sc, l_sc, acc_sc,
                  *, d_out, t_actual, t_pad, tk, compute_dtype):
    ki = pl.program_id(1)

    @pl.when(ki == 0)
    def _():
        # Q computed ONCE per q-tile (qi is the outer grid axis).
        q = jnp.dot(xq_ref[...].astype(compute_dtype),
                    wq_ref[...].astype(compute_dtype),
                    preferred_element_type=jnp.float32)
        q_sc[...] = q.astype(q_sc.dtype)
        m_sc[...] = jnp.full(m_sc.shape, -jnp.inf, dtype=m_sc.dtype)
        l_sc[...] = jnp.zeros(l_sc.shape, dtype=l_sc.dtype)
        acc_sc[...] = jnp.zeros(acc_sc.shape, dtype=acc_sc.dtype)

    kv = kv_ref[...]
    k = kv[:, :d_out]
    v = kv[:, d_out:]

    # q already carries 1/sqrt(d_out); contract feature dims (no transpose).
    s = lax.dot_general(q_sc[...], k,
                        dimension_numbers=(((1,), (1,)), ((), ())),
                        preferred_element_type=jnp.float32)     # (tq, tk)
    if t_pad != t_actual:
        col = ki * tk + lax.broadcasted_iota(jnp.int32, s.shape, 1)
        s = jnp.where(col < t_actual, s, -jnp.inf)

    m_prev = m_sc[...]
    m_new = jnp.maximum(m_prev, jnp.max(s, axis=-1, keepdims=True))
    alpha = jnp.exp(m_prev - m_new)
    p = jnp.exp(s - m_new)
    l_sc[...] = alpha * l_sc[...] + jnp.sum(p, axis=-1, keepdims=True)
    acc_sc[...] = alpha * acc_sc[...] + jnp.dot(
        p.astype(compute_dtype), v, preferred_element_type=jnp.float32)
    m_sc[...] = m_new

    @pl.when(ki == pl.num_programs(1) - 1)
    def _():
        o_ref[...] = (acc_sc[...] *
                      pl.reciprocal(l_sc[...], approx=True)).astype(o_ref.dtype)


# ----------------------------------------------------------------------------
# Public wrapper: matches SelfAttention_v1.forward(x) semantics.
# ----------------------------------------------------------------------------
def self_attention_v1(x, w_query, w_key, w_value, *,
                      compute_dtype=jnp.bfloat16, tq=256, tk=1024,
                      single_pass=None, single_block_max_t=256):
    """x: (T, d_in); weights: (d_in, d_out) -> context: (T, d_out)."""
    T, d_in = x.shape
    d_out = w_query.shape[1]
    scale = 1.0 / (d_out ** 0.5)
    vmem_limit = _vmem_limit_bytes()
    itemsize = jnp.dtype(compute_dtype).itemsize

    # Fold the softmax scale into W_query once, wrapper-side.
    wq_scaled = (w_query * scale).astype(x.dtype)

    # Tiny shapes: single VMEM block, no grid/pipeline overhead.
    if T <= single_block_max_t:
        w_qkv = jnp.concatenate([wq_scaled, w_key, w_value], axis=1)
        return _single_block(x, w_qkv, d_out, compute_dtype, vmem_limit)

    # ---- Tiled flash path (handles arbitrary T via padding + masking) ----
    tq = max(8, _round_up(int(tq), 8))

    # Single-pass feasibility: whole K/V slab resident + (tq, T_pad) scores.
    t_pad_sp = _round_up(T, tq)
    sp_bytes = (tq * t_pad_sp * 4 * 2                      # s and p (f32)
                + t_pad_sp * 2 * d_out * itemsize * 2)     # kv slab, 2x buf
    sp_fits = sp_bytes <= vmem_limit // 2
    use_single_pass = sp_fits if single_pass is None else (bool(single_pass)
                                                           and sp_fits)

    if use_single_pass:
        t_pad = t_pad_sp
        tk_eff = t_pad
    else:
        tk_eff = max(tq, _round_up(int(tk), tq))
        # Shrink kv tile until the per-step working set fits the budget.
        while tk_eff > tq and (tq * tk_eff * 4 * 2
                               + tk_eff * 2 * d_out * itemsize * 2
                               ) > vmem_limit // 2:
            tk_eff = max(tq, (tk_eff // 2 // tq) * tq)
        t_pad = _round_up(T, tk_eff)

    x_pad = x if t_pad == T else jnp.pad(x, ((0, t_pad - T), (0, 0)))

    # K/V projected once into a single lane-dense (T_pad, 2*d_out) slab.
    w_kv = jnp.concatenate([w_key, w_value], axis=1).astype(x.dtype)
    kv_slab = _kv_projection(x_pad, w_kv, compute_dtype, tr=tq,
                             vmem_limit=vmem_limit)

    if use_single_pass:
        kernel = functools.partial(
            _fused_single_pass_kernel, d_out=d_out, t_actual=T, t_pad=t_pad,
            compute_dtype=compute_dtype)
        out = pl.pallas_call(
            kernel,
            out_shape=jax.ShapeDtypeStruct((t_pad, d_out), x.dtype),
            grid_spec=pltpu.PrefetchScalarGridSpec(
                num_scalar_prefetch=0,
                grid=(t_pad // tq,),
                in_specs=[pl.BlockSpec((tq, d_in), lambda qi: (qi, 0)),
                          pl.BlockSpec((d_in, d_out), lambda qi: (0, 0)),
                          pl.BlockSpec((t_pad, 2 * d_out), lambda qi: (0, 0))],
                out_specs=pl.BlockSpec((tq, d_out), lambda qi: (qi, 0)),
            ),
            compiler_params=pltpu.CompilerParams(
                dimension_semantics=("parallel",),
                vmem_limit_bytes=vmem_limit),
        )(x_pad, wq_scaled, kv_slab)
    else:
        kernel = functools.partial(
            _flash_kernel, d_out=d_out, t_actual=T, t_pad=t_pad, tk=tk_eff,
            compute_dtype=compute_dtype)
        out = pl.pallas_call(
            kernel,
            out_shape=jax.ShapeDtypeStruct((t_pad, d_out), x.dtype),
            grid_spec=pltpu.PrefetchScalarGridSpec(
                num_scalar_prefetch=0,
                grid=(t_pad // tq, t_pad // tk_eff),
                in_specs=[pl.BlockSpec((tq, d_in), lambda qi, ki: (qi, 0)),
                          pl.BlockSpec((d_in, d_out), lambda qi, ki: (0, 0)),
                          pl.BlockSpec((tk_eff, 2 * d_out),
                                       lambda qi, ki: (ki, 0))],
                out_specs=pl.BlockSpec((tq, d_out), lambda qi, ki: (qi, 0)),
                scratch_shapes=[pltpu.VMEM((tq, d_out), compute_dtype),
                                pltpu.VMEM((tq, 1), jnp.float32),
                                pltpu.VMEM((tq, 1), jnp.float32),
                                pltpu.VMEM((tq, d_out), jnp.float32)],
            ),
            compiler_params=pltpu.CompilerParams(
                # q-tile axis parallel (v7x megacore); kv axis carries the
                # online-softmax state -> arbitrary.
                dimension_semantics=("parallel", "arbitrary"),
                vmem_limit_bytes=vmem_limit),
        )(x_pad, wq_scaled, kv_slab)

    return out[:T] if t_pad != T else out


def _reference(x, wq, wk, wv):
    q = x @ wq
    k = x @ wk
    v = x @ wv
    scores = q @ k.T
    w = jax.nn.softmax(scores / (k.shape[-1] ** 0.5), axis=-1)
    return w @ v


if __name__ == "__main__":
    # --- Toy case: the exact inputs from the notes (T=6, d_in=3, d_out=2) ---
    x = jnp.array(
        [[0.43, 0.15, 0.89],
         [0.55, 0.87, 0.66],
         [0.57, 0.85, 0.64],
         [0.22, 0.58, 0.33],
         [0.77, 0.25, 0.10],
         [0.05, 0.80, 0.55]],
        dtype=jnp.float32,
    )
    d_in = x.shape[1]
    d_out = 2

    key = jax.random.PRNGKey(0)
    kq, kk, kv = jax.random.split(key, 3)
    w_query = jax.random.uniform(kq, (d_in, d_out), dtype=jnp.float32)
    w_key = jax.random.uniform(kk, (d_in, d_out), dtype=jnp.float32)
    w_value = jax.random.uniform(kv, (d_in, d_out), dtype=jnp.float32)

    ref = _reference(x, w_query, w_key, w_value)

    # Strict f32 path (exact softmax divide on f32).
    out_f32 = jax.block_until_ready(
        self_attention_v1(x, w_query, w_key, w_value,
                          compute_dtype=jnp.float32))
    assert out_f32.shape == (x.shape[0], d_out)
    assert jnp.allclose(out_f32, ref, atol=5e-3, rtol=5e-3), (out_f32, ref)

    # Default bf16-MXU path (f32 accumulation + f32 softmax).
    out_bf16 = jax.block_until_ready(
        self_attention_v1(x, w_query, w_key, w_value))
    assert out_bf16.shape == (x.shape[0], d_out)
    assert jnp.allclose(out_bf16, ref, atol=3e-2, rtol=3e-2), (out_bf16, ref)

    # --- Tile-friendly case: single-pass fused path (K/V slab resident) ---
    T2, d_in2, d_out2 = 512, 256, 128
    k1, k2, k3, k4 = jax.random.split(jax.random.PRNGKey(0), 4)
    sw = 1.0 / (d_in2 ** 0.5)
    x2 = 0.5 * jax.random.normal(k1, (T2, d_in2), dtype=jnp.float32)
    wq2 = sw * jax.random.normal(k2, (d_in2, d_out2), dtype=jnp.float32)
    wk2 = sw * jax.random.normal(k3, (d_in2, d_out2), dtype=jnp.float32)
    wv2 = sw * jax.random.normal(k4, (d_in2, d_out2), dtype=jnp.float32)
    ref2 = _reference(x2, wq2, wk2, wv2)

    out_sp = jax.block_until_ready(
        self_attention_v1(x2, wq2, wk2, wv2, tq=128))
    assert out_sp.shape == (T2, d_out2)
    assert jnp.allclose(out_sp, ref2, atol=2e-2, rtol=2e-2), (
        float(jnp.max(jnp.abs(out_sp - ref2))))

    # --- Ragged T: exercises padding + key masking on BOTH tiled kernels ---
    T3, d_in3, d_out3 = 450, 128, 128
    k1, k2, k3, k4 = jax.random.split(jax.random.PRNGKey(0), 4)
    sw3 = 1.0 / (d_in3 ** 0.5)
    x3 = 0.5 * jax.random.normal(k1, (T3, d_in3), dtype=jnp.float32)
    wq3 = sw3 * jax.random.normal(k2, (d_in3, d_out3), dtype=jnp.float32)
    wk3 = sw3 * jax.random.normal(k3, (d_in3, d_out3), dtype=jnp.float32)
    wv3 = sw3 * jax.random.normal(k4, (d_in3, d_out3), dtype=jnp.float32)
    ref3 = _reference(x3, wq3, wk3, wv3)

    out_auto = jax.block_until_ready(          # auto -> single-pass + masking
        self_attention_v1(x3, wq3, wk3, wv3, tq=128))
    out_online = jax.block_until_ready(        # forced online-softmax kv loop
        self_attention_v1(x3, wq3, wk3, wv3, tq=128, tk=128,
                          single_pass=False))
    assert out_auto.shape == (T3, d_out3)
    assert out_online.shape == (T3, d_out3)
    assert jnp.allclose(out_auto, ref3, atol=2e-2, rtol=2e-2), (
        float(jnp.max(jnp.abs(out_auto - ref3))))
    assert jnp.allclose(out_online, ref3, atol=2e-2, rtol=2e-2), (
        float(jnp.max(jnp.abs(out_online - ref3))))
    assert jnp.allclose(out_auto, out_online, atol=1e-2, rtol=1e-2), (
        float(jnp.max(jnp.abs(out_auto - out_online))))

    print("KERNEL_OK")
</pallas_src>

<mosaic_0001>
module attributes {stable_mosaic.version = 11 : i64} {
  func.func @_single_block_kernel(%arg0: memref<6x3xf32, #tpu.memory_space<vmem>>, %arg1: memref<3x6xf32, #tpu.memory_space<vmem>>, %arg2: memref<6x2xf32, #tpu.memory_space<vmem>>) attributes {dimension_semantics = [], scalar_prefetch = 0 : i64, scratch_operands = 0 : i64, tpu.core_type = #tpu.core_type<tc>} {
    %c0 = arith.constant 0 : index
    %c0_0 = arith.constant 0 : index
    %0 = vector.load %arg0[%c0, %c0_0] : memref<6x3xf32, #tpu.memory_space<vmem>>, vector<6x3xf32>
    %c0_1 = arith.constant 0 : index
    %c0_2 = arith.constant 0 : index
    %1 = vector.load %arg1[%c0_1, %c0_2] : memref<3x6xf32, #tpu.memory_space<vmem>>, vector<3x6xf32>
    %cst = arith.constant dense<0.000000e+00> : vector<6x6xf32>
    %2 = tpu.matmul %0, %1, %cst {dimension_numbers = #tpu.dot_dimension_numbers<[1], [0], [0], [1], [0, 0, 1, 1], [], []>} : vector<6x3xf32>, vector<3x6xf32>, vector<6x6xf32> -> vector<6x6xf32>
    %3 = vector.extract_strided_slice %2 {offsets = [0, 0], sizes = [6, 2], strides = [1, 1]} : vector<6x6xf32> to vector<6x2xf32>
    %4 = vector.extract_strided_slice %2 {offsets = [0, 2], sizes = [6, 2], strides = [1, 1]} : vector<6x6xf32> to vector<6x2xf32>
    %5 = vector.extract_strided_slice %2 {offsets = [0, 4], sizes = [6, 2], strides = [1, 1]} : vector<6x6xf32> to vector<6x2xf32>
    %cst_3 = arith.constant dense<0.000000e+00> : vector<6x6xf32>
    %6 = tpu.matmul %3, %4, %cst_3 {dimension_numbers = #tpu.dot_dimension_numbers<[1], [1], [0], [0], [0, 0, 1, 0], [], []>} : vector<6x2xf32>, vector<6x2xf32>, vector<6x6xf32> -> vector<6x6xf32>
    %cst_4 = arith.constant dense<0xFF800000> : vector<6xf32>
    %7 = vector.multi_reduction <maximumf>, %6, %cst_4 [1] : vector<6x6xf32> to vector<6xf32>
    %8 = vector.shape_cast %7 : vector<6xf32> to vector<6x1xf32>
    %9 = vector.broadcast %8 : vector<6x1xf32> to vector<6x6xf32>
    %10 = arith.subf %6, %9 : vector<6x6xf32>
    %11 = math.exp %10 : vector<6x6xf32>
    %cst_5 = arith.constant dense<0.000000e+00> : vector<6xf32>
    %12 = vector.multi_reduction <add>, %11, %cst_5 [1] : vector<6x6xf32> to vector<6xf32>
    %13 = vector.shape_cast %12 : vector<6xf32> to vector<6x1xf32>
    %14 = tpu.reciprocal %13 : vector<6x1xf32> -> vector<6x1xf32>
    %15 = vector.broadcast %14 : vector<6x1xf32> to vector<6x6xf32>
    %16 = arith.mulf %11, %15 : vector<6x6xf32>
    %cst_6 = arith.constant dense<0.000000e+00> : vector<6x2xf32>
    %17 = tpu.matmul %16, %5, %cst_6 {dimension_numbers = #tpu.dot_dimension_numbers<[1], [0], [0], [1], [0, 0, 1, 1], [], []>} : vector<6x6xf32>, vector<6x2xf32>, vector<6x2xf32> -> vector<6x2xf32>
    %c0_7 = arith.constant 0 : index
    %c0_8 = arith.constant 0 : index
    %18 = vector.load %arg2[%c0_7, %c0_8] : memref<6x2xf32, #tpu.memory_space<vmem>>, vector<6x2xf32>
    tpu.vector_store %arg2[%c0_7, %c0_8], %17 {strides = array<i32>} : memref<6x2xf32, #tpu.memory_space<vmem>>, vector<6x2xf32>,
    return
  }
}

</mosaic_0001>

<bundles_post_ra>
// kernel: tpu_custom_call.1
= control target key start
LH: loop header
LB: loop body
LE: loop exit
PB: predicated region body
PF: predicated region fallthrough
CT: control target
= control target key end

     0   :  { %vm17_vm0 = vcmask 1042432   ;;  %vm13_vm1 = vcmask 23552   ;;  %v301_v0 = vmov 0.0   ;;  %vm302_vm2 = vmmov 0   ;;  %s303_s13 = smov 126   ;;  %s329_s1 = inlined_call_operand.vmem [shape: f32[3,6], index: 1, kind: input, shape index: {}]   ;;  %s330_s0 = inlined_call_operand.vmem [shape: f32[6,3], index: 0, kind: input, shape index: {}]   ;;  %s331_s2 = inlined_call_operand.vmem [shape: f32[6,2], index: 2, kind: output, shape index: {}]  }
   0x1   :  { %278 = vmatprep.subr.mxu0 %v301_v0  ;;  %v12_v1 = vld [vmem:[%s329_s1] sm:$0x7]  ;;  %280 = vmatprep.mubr.msk.f32.mxu0 %vm302_vm2, %v301_v0  ;;  %vm94_vm3 = vcmask 15360   ;;  %vm169_vm4 = vcmask 46080   ;;  %vm187_vm5 = vcmask 1045504   ;;  %vm183_vm6 = vcmask 48128  }
   0x2   :  { %v11_v2 = vld [vmem:[%s330_s0] sm:$0x3f]  ;;  %279 = vmatpush3.msk.msra.mxu0 %vm17_vm0, %v12_v1  ;;  %283 = vmatprep.subr.mxu1 %v301_v0  ;;  %s304_s0 = smov 124   ;;  %vm260_vm7 = vcmask 13312  }
   0x3   :  { %281 = vmatmul.mubr.msk.f32.vlgmr.msra.gmra.mrb[0].mxu0 %vm13_vm1, %v11_v2  ;;  %285 = vmatprep.mubr.msk.f32.mxu1 %vm302_vm2, %v301_v0 }
   0x4   :  { %288 = vmatprep.subr.mxu0 %v301_v0  ;;  %290 = vmatprep.mubr.msk.f32.mxu0 %vm302_vm2, %v301_v0 }
  0xd6   :  { %v87_v3 = vpop.f32.mrb[0].mxu0 }
  0xd7   :  { %92 = vrot.lane.b32.xlu0 %v87_v3, %s303_s13  ;;  %v282_v4 = vpop.f32.mrb[1].mxu0 }
 0x149   :  { %v93_v5 = vpop.permute.xlu0 %92 }
 0x14a   :  { %284 = vmatpush3.xpose.msk.msra.mxu1 %vm94_vm3, %v93_v5 }
 0x14d   :  { %286 = vmatmul.mubr.msk.f32.vlgmr.msra.gmra.mrb[0].mxu1 %vm94_vm3, %v87_v3 }
 0x220   :  { %v165_v6 = vpop.f32.mrb[0].mxu1 }
 0x221   :  { %v287_v7 = vpop.f32.mrb[1].mxu1  ;;  %v170_v8 = vsel %vm169_vm4, %v165_v6, -inf }
 0x222   :  { %171 = vmax.xlane.f32.xlu0 %v170_v8 }
 0x2af   :  { %v172_v9 = vpop.xlane.xlu0 %171 }
 0x2b0   :  { %v173_v10 = vsub.f32 %v165_v6, %v172_v9 }
 0x2b2   :  { %v174_v11 = vmul.f32 1.442695, %v173_v10 }
 0x2b4   :  { %297 = vpow2.f32 %v174_v11 }
 0x2be   :  { %v298_v12 = vpop.eup %297 }
 0x2bf   :  { %v176_v13 = vsel %vm169_vm4, %v298_v12, 0.0 }
 0x2c0   :  { %177 = vadd.xlane.f32.xlu1 %v176_v13 }
 0x2d1   :  { %181 = vrot.lane.b32.xlu1 %v87_v3, %s304_s0 }
 0x34d   :  { %v178_v14 = vpop.xlane.xlu1 %177 }
 0x34e   :  { %299 = vrcp.f32 %v178_v14 }
 0x351   :  { %v182_v15 = vpop.permute.xlu1 %181 }
 0x352   :  { %289 = vmatpush3.msk.msra.mxu0 %vm187_vm5, %v182_v15 }
 0x358   :  { %v300_v16 = vpop.eup %299 }
 0x359   :  { %v180_v17 = vmul.f32 %v300_v16, %v298_v12 }
 0x35b   :  { %291 = vmatmul.mubr.msk.f32.vlgmr.msra.gmra.mrb[2].mxu0 %vm183_vm6, %v180_v17 }
 0x42e   :  { %v256_v18 = vpop.f32.mrb[2].mxu0 }
 0x42f   :  { %261 = vst.msk [vmem:[%s331_s2] sm:$0x3f] %vm260_vm7, %v256_v18  ;;  %v292_v19 = vpop.f32.mrb[3].mxu0 }

</bundles_post_ra>
